<compile_context>
chip_gen: v7x
topology: tpu7x:2x2x1
jax: 0.10.0
libtpu: 0.0.40
codegen_flags: <defaults>
</compile_context>

<pallas_src>
import functools

import jax
import jax.numpy as jnp
from jax.experimental import pallas as pl
from jax.experimental.pallas import tpu as pltpu

_LANES = 128  # pad width for the narrow (N, 1) outputs -> lane-dense stores


def _attention_kernel(feat_ref, w_ref, b_ref, ctx_ref, outc_ref, alpha_ref):
    f = feat_ref[...]                 # (N, D) f32
    w = w_ref[...]                    # (1, D) f32  (PyTorch W_1 layout)
    b = b_ref[...]                    # (1, 1) f32

    n = f.shape[0]

    # out_c[i] = <features[i, :], W_1[0, :]> + b_1   (F.linear, out_features=1)
    scores = jnp.sum(f * w, axis=1, keepdims=True) + b        # (N, 1)

    # Batch-axis softmax: exp(out_c - global max) / sum over batch.
    m = jnp.max(scores)
    e = jnp.exp(scores - m)                                   # (N, 1)
    alpha = e / jnp.sum(e)                                    # (N, 1)

    # context = features * (N * alpha) broadcast over the feature axis.
    ctx_ref[...] = f * (jnp.float32(n) * alpha)               # (N, D)

    # Lane-dense stores for the width-1 results (unmasked vst).
    outc_ref[...] = jnp.broadcast_to(scores, (n, _LANES))
    alpha_ref[...] = jnp.broadcast_to(alpha, (n, _LANES))


@functools.partial(jax.jit, static_argnames=("flag",))
def attention_forward(features, W_1, b_1, flag=1):
    """flag==1 path of AttentionLayer.forward.

    The flag != 1 branch of the original PyTorch module references an
    undefined `out_c` and cannot execute, so only flag == 1 is implemented.
    """
    if flag != 1:
        raise NotImplementedError("Only the flag == 1 path is well-defined.")

    features = features.astype(jnp.float32)
    W_1 = W_1.astype(jnp.float32).reshape(1, -1)
    b2d = b_1.astype(jnp.float32).reshape(1, 1)

    N, D = features.shape

    cost = pl.CostEstimate(
        flops=5 * N * D,
        transcendentals=N,
        bytes_accessed=4 * (N * D + D + 1 + N * D + 2 * N * _LANES),
    )

    ctx, outc_slab, alpha_slab = pl.pallas_call(
        _attention_kernel,
        out_shape=(
            jax.ShapeDtypeStruct((N, D), jnp.float32),
            jax.ShapeDtypeStruct((N, _LANES), jnp.float32),
            jax.ShapeDtypeStruct((N, _LANES), jnp.float32),
        ),
        in_specs=[
            pl.BlockSpec(memory_space=pltpu.MemorySpace.VMEM),
            pl.BlockSpec(memory_space=pltpu.MemorySpace.VMEM),
            pl.BlockSpec(memory_space=pltpu.MemorySpace.VMEM),
        ],
        out_specs=(
            pl.BlockSpec(memory_space=pltpu.MemorySpace.VMEM),
            pl.BlockSpec(memory_space=pltpu.MemorySpace.VMEM),
            pl.BlockSpec(memory_space=pltpu.MemorySpace.VMEM),
        ),
        cost_estimate=cost,
    )(features, W_1, b2d)

    out_c = outc_slab[:, :1]   # (N, 1) — matches PyTorch out_c
    alpha = alpha_slab[:, 0]   # (N,)   — matches torch.squeeze(alpha)
    return ctx, out_c, alpha


if __name__ == "__main__":
    key = jax.random.PRNGKey(0)
    k_f, k_w, k_b = jax.random.split(key, 3)

    batch, dim = 8, 512
    features = jax.random.normal(k_f, (batch, dim), jnp.float32)
    bound = 1.0 / jnp.sqrt(dim)
    W_1 = jax.random.uniform(k_w, (1, dim), jnp.float32, -bound, bound)
    b_1 = jax.random.uniform(k_b, (1,), jnp.float32, -bound, bound)

    ctx, out_c, alpha = attention_forward(features, W_1, b_1, flag=1)
    ctx, out_c, alpha = jax.block_until_ready((ctx, out_c, alpha))

    # Pure-JAX reference mirroring the PyTorch forward (flag == 1).
    ref_scores = jnp.sum(features * W_1, axis=1, keepdims=True) + b_1   # (N, 1)
    ref_e = jnp.exp(ref_scores - ref_scores.max())
    ref_alpha = ref_e / ref_e.sum(axis=0)                               # (N, 1)
    ref_ctx = features * (batch * ref_alpha)                            # (N, D)

    assert ctx.shape == (batch, dim)
    assert out_c.shape == (batch, 1)
    assert alpha.shape == (batch,)
    assert jnp.allclose(out_c, ref_scores, atol=1e-4, rtol=1e-4)
    assert jnp.allclose(alpha, ref_alpha[:, 0], atol=1e-4, rtol=1e-4)
    assert jnp.allclose(ctx, ref_ctx, atol=1e-4, rtol=1e-4)

    print("KERNEL_OK")
</pallas_src>

<mosaic_0001>
module attributes {stable_mosaic.version = 11 : i64} {
  func.func @_attention_kernel(%arg0: memref<8x512xf32, #tpu.memory_space<vmem>>, %arg1: memref<1x512xf32, #tpu.memory_space<vmem>>, %arg2: memref<1x1xf32, #tpu.memory_space<vmem>>, %arg3: memref<8x512xf32, #tpu.memory_space<vmem>>, %arg4: memref<8x128xf32, #tpu.memory_space<vmem>>, %arg5: memref<8x128xf32, #tpu.memory_space<vmem>>) attributes {dimension_semantics = [], scalar_prefetch = 0 : i64, scratch_operands = 0 : i64, tpu.core_type = #tpu.core_type<tc>} {
    %c0 = arith.constant 0 : index
    %c0_0 = arith.constant 0 : index
    %0 = vector.load %arg0[%c0, %c0_0] : memref<8x512xf32, #tpu.memory_space<vmem>>, vector<8x512xf32>
    %c0_1 = arith.constant 0 : index
    %c0_2 = arith.constant 0 : index
    %1 = vector.load %arg1[%c0_1, %c0_2] : memref<1x512xf32, #tpu.memory_space<vmem>>, vector<1x512xf32>
    %c0_3 = arith.constant 0 : index
    %c0_4 = arith.constant 0 : index
    %2 = vector.load %arg2[%c0_3, %c0_4] : memref<1x1xf32, #tpu.memory_space<vmem>>, vector<1x1xf32>
    %3 = vector.broadcast %1 : vector<1x512xf32> to vector<8x512xf32>
    %4 = arith.mulf %0, %3 : vector<8x512xf32>
    %cst = arith.constant dense<0.000000e+00> : vector<8xf32>
    %5 = vector.multi_reduction <add>, %4, %cst [1] : vector<8x512xf32> to vector<8xf32>
    %6 = vector.shape_cast %5 : vector<8xf32> to vector<8x1xf32>
    %7 = vector.broadcast %2 : vector<1x1xf32> to vector<8x1xf32>
    %8 = arith.addf %6, %7 : vector<8x1xf32>
    %9 = vector.shape_cast %8 : vector<8x1xf32> to vector<1x8x1xf32>
    %cst_5 = arith.constant dense<0xFF800000> : vector<1xf32>
    %10 = vector.multi_reduction <maximumf>, %9, %cst_5 [1, 2] : vector<1x8x1xf32> to vector<1xf32>
    %11 = vector.shape_cast %10 : vector<1xf32> to vector<1x1x1xf32>
    %12 = vector.extract %11[0, 0, 0] : f32 from vector<1x1x1xf32>
    %13 = vector.broadcast %12 : f32 to vector<8x1xf32>
    %14 = arith.subf %8, %13 : vector<8x1xf32>
    %15 = math.exp %14 : vector<8x1xf32>
    %16 = vector.shape_cast %15 : vector<8x1xf32> to vector<1x8x1xf32>
    %cst_6 = arith.constant dense<0.000000e+00> : vector<1xf32>
    %17 = vector.multi_reduction <add>, %16, %cst_6 [1, 2] : vector<1x8x1xf32> to vector<1xf32>
    %18 = vector.shape_cast %17 : vector<1xf32> to vector<1x1x1xf32>
    %19 = vector.extract %18[0, 0, 0] : f32 from vector<1x1x1xf32>
    %20 = vector.broadcast %19 : f32 to vector<8x1xf32>
    %21 = arith.divf %15, %20 : vector<8x1xf32>
    %cst_7 = arith.constant 8.000000e+00 : f32
    %22 = vector.broadcast %cst_7 : f32 to vector<8x1xf32>
    %23 = arith.mulf %22, %21 : vector<8x1xf32>
    %24 = vector.broadcast %23 : vector<8x1xf32> to vector<8x512xf32>
    %25 = arith.mulf %0, %24 : vector<8x512xf32>
    %c0_8 = arith.constant 0 : index
    %c0_9 = arith.constant 0 : index
    %26 = vector.load %arg3[%c0_8, %c0_9] : memref<8x512xf32, #tpu.memory_space<vmem>>, vector<8x512xf32>
    tpu.vector_store %arg3[%c0_8, %c0_9], %25 {strides = array<i32>} : memref<8x512xf32, #tpu.memory_space<vmem>>, vector<8x512xf32>,
    %27 = vector.shape_cast %8 : vector<8x1xf32> to vector<8x1xf32>
    %28 = vector.broadcast %27 : vector<8x1xf32> to vector<8x128xf32>
    %c0_10 = arith.constant 0 : index
    %c0_11 = arith.constant 0 : index
    %29 = vector.load %arg4[%c0_10, %c0_11] : memref<8x128xf32, #tpu.memory_space<vmem>>, vector<8x128xf32>
    tpu.vector_store %arg4[%c0_10, %c0_11], %28 {strides = array<i32>} : memref<8x128xf32, #tpu.memory_space<vmem>>, vector<8x128xf32>,
    %30 = vector.shape_cast %21 : vector<8x1xf32> to vector<8x1xf32>
    %31 = vector.broadcast %30 : vector<8x1xf32> to vector<8x128xf32>
    %c0_12 = arith.constant 0 : index
    %c0_13 = arith.constant 0 : index
    %32 = vector.load %arg5[%c0_12, %c0_13] : memref<8x128xf32, #tpu.memory_space<vmem>>, vector<8x128xf32>
    tpu.vector_store %arg5[%c0_12, %c0_13], %31 {strides = array<i32>} : memref<8x128xf32, #tpu.memory_space<vmem>>, vector<8x128xf32>,
    return
  }
}

</mosaic_0001>

<bundles_post_ra>
// kernel: attention_forward.1
= control target key start
LH: loop header
LB: loop body
LE: loop exit
PB: predicated region body
PF: predicated region fallthrough
CT: control target
= control target key end

     0   :  { %s297_s0 = inlined_call_operand.hbm [shape: f32[8,512], index: 0, kind: input, shape index: {}]   ;;  %s298_s1 = inlined_call_operand.vmem [shape: f32[1,512], index: 1, kind: input, shape index: {}]   ;;  %s299_s2 = inlined_call_operand.<no memory space> [shape: f32[1,1], index: 2, kind: input, shape index: {}]   ;;  %s300_s3 = inlined_call_operand.hbm [shape: f32[8,512], index: 3, kind: output, shape index: {0}]   ;;  %s301_s4 = inlined_call_operand.vmem [shape: f32[8,128], index: 4, kind: output, shape index: {1}]   ;;  %s302_s5 = inlined_call_operand.vmem [shape: f32[8,128], index: 5, kind: output, shape index: {2}]  }
   0x1   :  { %v11_v0 = vstv %s299_s2 }
   0x2   :  { %12 = vst [vmem:[#allocation2] sm:$0x1] %v11_v0 }
   0x3   :  { %13 = vsyncpa [#allocation4], 0 }
   0x4   :  { %14 = vsyncpa [#allocation5], 0  ;;  %s214_s20 = smov [#allocation3]   ;;  %s166_s24 = scalar_lea.hbm %s297_s0, 512 }
   0x5   :  { %s21_s21 = sshll.u32 %s214_s20, 4  ;;  %p167_p0 = scmp.ne.s32.totalorder %s297_s0, %s166_s24  ;;  %s22_s21 = int_to_ptr.vmem [resolvable:$true] %s21_s21 }
   0x6   :  { %p170_p1 = scmp.lt.u32.totalorder %s166_s24, %s297_s0 }
   0x8   :  { %p172_p2 = pnand %p170_p1, %p167_p0 }
   0xa   :  { %175 = shalt.err (!%p172_p2)
}
   0xb   :  { %s176_s2 = scalar_lea.vmem %s22_s21, 512  ;;  %p181_p4 = scmp.lt.s32.totalorder %s22_s21, %s22_s21 }
   0xc   :  { %p177_p3 = scmp.ne.s32.totalorder %s22_s21, %s176_s2  ;;  %p182_p5 = scmp.lt.s32.totalorder %s176_s2, %s176_s2 }
   0xe   :  { %p183_p6 = por %p182_p5, %p181_p4 }
  0x10   :  { %p184_p7 = pnand %p183_p6, %p177_p3 }
  0x12   :  { %187 = shalt.err (!%p184_p7)
}
  0x13   :  { %24 = dma.hbm_to_vmem [thread:$0]  %s297_s0, 512, %s22_s21, [#allocation4]  }
  0x14   :  { %210 = dma.done.wait [#allocation4], 512  }
  0x15   :  { %211 = vsyncadd [#allocation4], 4294966784  ;;  %v39_v1 = vlaneseq  ;;  %v262_v7 = vld [vmem:[#allocation3] sm:$0xff]  ;;  %v264_v8 = vld [vmem:[#allocation3 + $0x8] sm:$0xff]  ;;  %v215_v23 = vmov 0   ;;  %vm75_vm0 = vcmask 7168  }
  0x16   :  { %v266_v9 = vld [vmem:[#allocation3 + $0x10] sm:$0xff]  ;;  %v36_v10 = vld [vmem:[%s298_s1] sm:$0xf]  ;;  %161 = vset.pattern.permute.xlu0 %v215_v23  ;;  %160 = vset.pattern.permute.xlu1 %v215_v23  ;;  %s216_s9 = smov [#allocation6]  }
  0x17   :  { %v40_v2 = vshrl.u32 %v39_v1, 7  ;;  %v35_v15 = vld [vmem:[#allocation3 + $0x18] sm:$0xff]  ;;  %s135_s10 = sshll.u32 %s216_s9, 4  ;;  %s136_s10 = int_to_ptr.vmem [resolvable:$true] %s135_s10 }
  0x18   :  { %v152_v24 = vld [vmem:[#allocation2] ss:$0 sm:$0xff]  ;;  %s188_s11 = scalar_lea.vmem %s136_s10, 512  ;;  %p193_p9 = scmp.lt.s32.totalorder %s136_s10, %s136_s10 }
  0x19   :  { %v41_v3 = vsub.s32 0, %v40_v2  ;;  %v45_v4 = vsub.s32 1, %v40_v2  ;;  %v49_v5 = vsub.s32 2, %v40_v2  ;;  %v53_v6 = vsub.s32 3, %v40_v2  ;;  %p189_p8 = scmp.ne.s32.totalorder %s136_s10, %s188_s11  ;;  %p194_p10 = scmp.lt.s32.totalorder %s188_s11, %s188_s11 }
  0x1b   :  { %v42_v11 = vrot.slane %v36_v10, %v41_v3  ;;  %v46_v12 = vrot.slane %v36_v10, %v45_v4  ;;  %v50_v13 = vrot.slane %v36_v10, %v49_v5  ;;  %v54_v14 = vrot.slane %v36_v10, %v53_v6  ;;  %p195_p11 = por %p194_p10, %p193_p9 }
  0x1d   :  { %v59_v16 = vmul.f32 %v42_v11, %v262_v7  ;;  %v60_v17 = vmul.f32 %v46_v12, %v264_v8  ;;  %v61_v18 = vmul.f32 %v50_v13, %v266_v9  ;;  %v62_v19 = vmul.f32 %v54_v14, %v35_v15  ;;  %p196_p12 = pnand %p195_p11, %p189_p8 }
  0x1f   :  { %v63_v20 = vadd.f32 %v60_v17, %v59_v16 }
  0x21   :  { %v64_v21 = vadd.f32 %v63_v20, %v61_v18 }
  0x23   :  { %v65_v22 = vadd.f32 %v64_v21, %v62_v19 }
  0x25   :  { %66 = vadd.xlane.f32.xlu0 %v65_v22 }
  0xb2   :  { %v67_v25 = vpop.xlane.xlu0 %66 }
  0xb3   :  { %v74_v26 = vadd.f32 %v152_v24, %v67_v25 }
  0xb5   :  { %v76_v27 = vsel %vm75_vm0, %v74_v26, -inf }
  0xb6   :  { %77 = vmax.xlane.f32.xlu0 %v76_v27 }
  0xcc   :  { %119 = vperm.xlu0 %161, %v74_v26  }
 0x143   :  { %v78_v28 = vpop.xlane.xlu0 %77 }
 0x144   :  { %v79_v29 = vrot.slane %v78_v28, 4 }
 0x146   :  { %v80_v30 = vmax.f32 %v78_v28, %v79_v29 }
 0x148   :  { %v81_v31 = vrot.slane %v80_v30, 2 }
 0x14a   :  { %v82_v32 = vmax.f32 %v80_v30, %v81_v31 }
 0x14b   :  { %v120_v33 = vpop.permute.xlu0 %119 }
 0x14c   :  { %122 = vst [vmem:[%s301_s4] sm:$0xff] %v120_v33  ;;  %v83_v34 = vrot.slane %v82_v32, 1 }
 0x14e   :  { %v84_v35 = vmax.f32 %v82_v32, %v83_v34 }
 0x150   :  { %153 = vpush %v84_v35 }
 0x181   :  { %s154_s8 = spop %153 }
 0x182   :  { %v86_v36 = vstv %s154_s8 }
 0x183   :  { %v87_v37 = vsub.f32 %v74_v26, %v86_v36 }
 0x185   :  { %v88_v38 = vmul.f32 1.442695, %v87_v37 }
 0x187   :  { %162 = vpow2.f32 %v88_v38 }
 0x191   :  { %v163_v39 = vpop.eup %162 }
 0x192   :  { %v90_v40 = vsel %vm75_vm0, %v163_v39, 0.0 }
 0x193   :  { %91 = vadd.xlane.f32.xlu1 %v90_v40 }
 0x220   :  { %v92_v41 = vpop.xlane.xlu1 %91 }
 0x221   :  { %v93_v42 = vrot.slane %v92_v41, 4 }
 0x223   :  { %v94_v43 = vadd.f32 %v93_v42, %v92_v41 }
 0x225   :  { %v95_v44 = vrot.slane %v94_v43, 2 }
 0x227   :  { %v96_v45 = vadd.f32 %v95_v44, %v94_v43 }
 0x229   :  { %v97_v46 = vrot.slane %v96_v45, 1 }
 0x22b   :  { %v98_v47 = vadd.f32 %v97_v46, %v96_v45 }
 0x22d   :  { %155 = vpush %v98_v47 }
 0x25e   :  { %s156_s4 = spop %155 }
 0x25f   :  { %v100_v48 = vstv %s156_s4 }
 0x260   :  { %164 = vrcp.f32 %v100_v48 }
 0x26a   :  { %v165_v49 = vpop.eup %164 }
 0x26b   :  { %v102_v50 = vmul.f32 %v165_v49, %v163_v39 }
 0x26d   :  { %v103_v51 = vmul.f32 8.0, %v102_v50 }
 0x26f   :  { %106 = vperm.xlu1 %160, %v103_v51  }
 0x273   :  { %125 = vperm.xlu1 %160, %v102_v50  }
 0x2ee   :  { %v107_v52 = vpop.permute.xlu1 %106 }
 0x2ef   :  { %v109_v53 = vmul.f32 %v107_v52, %v262_v7  ;;  %v110_v54 = vmul.f32 %v107_v52, %v264_v8  ;;  %v111_v55 = vmul.f32 %v107_v52, %v266_v9  ;;  %v112_v56 = vmul.f32 %v107_v52, %v35_v15 }
 0x2f1   :  { %113 = vst [vmem:[#allocation6] sm:$0xff] %v109_v53  ;;  %114 = vst [vmem:[#allocation6 + $0x8] sm:$0xff] %v110_v54 }
 0x2f2   :  { %115 = vst [vmem:[#allocation6 + $0x10] sm:$0xff] %v111_v55  ;;  %116 = vst [vmem:[#allocation6 + $0x18] sm:$0xff] %v112_v56  ;;  %v126_v57 = vpop.permute.xlu1 %125 }
 0x2f3   :  { %199 = shalt.err (!%p196_p12)
}
 0x2f4   :  { %s200_s14 = scalar_lea.hbm %s300_s3, 512 }
 0x2f5   :  { %p201_p13 = scmp.ne.s32.totalorder %s300_s3, %s200_s14  ;;  %p204_p0 = scmp.lt.u32.totalorder %s200_s14, %s300_s3 }
 0x2f7   :  { %p206_p1 = pnand %p204_p0, %p201_p13 }
 0x2f9   :  { %209 = shalt.err (!%p206_p1)
}
 0x2fa   :  { %138 = dma.vmem_to_hbm [thread:$0]  %s136_s10, 512, %s300_s3, [#allocation5]   ;;  %128 = vst [vmem:[%s302_s5] sm:$0xff] %v126_v57 }
 0x2fb   :  { %212 = dma.done.wait [#allocation5], 512  }
 0x2fc   :  { %213 = vsyncadd [#allocation5], 4294966784 }
 0x2fd   :  { %150 = vsyncpa [#allocation4], 1 }
 0x2fe   :  { %151 = vsyncpa [#allocation5], 1 }

</bundles_post_ra>
